<compile_context>
chip_gen: v6e
topology: v6e:2x2x1
jax: 0.10.0
libtpu: 0.0.40
codegen_flags: <defaults>
</compile_context>

<pallas_src>
import math

import jax
import jax.numpy as jnp
from jax import lax
from jax.experimental import pallas as pl
from jax.experimental.pallas import tpu as pltpu

# GNNExplainer-style hyper-parameters ("av"), baked as constants.
FEAT_MASK_SZ_COEFF = 0.1
EDGE_MASK_SZ_COEFF = 0.5
FEAT_MASK_ENT_COEFF = 0.1
EDGE_MASK_ENT_COEFF = 1.0
EPS = 1e-15          # clamp inside the entropy logs (matches PyG's EPS)


def _gnn_explainer_kernel(xsrc_ref, dst_ref, w1_ref, b1_ref, pool_ref,
                          w2_ref, b2_ref,                 # shared graph / GNN tensors
                          y_ref, fm_ref, em_ref,          # per-chunk labels + masks
                          out_ref):                       # (TB, 1) losses
    TB, F = fm_ref.shape
    E = em_ref.shape[1]
    N = dst_ref.shape[0]
    H = w1_ref.shape[1]
    C = w2_ref.shape[1]

    # --- masks (elementwise math in f32) -------------------------------------
    fm = jax.nn.sigmoid(fm_ref[...])          # (TB, F)
    em = jax.nn.sigmoid(em_ref[...])          # (TB, E)

    # --- edge-masked dst incidence for the whole chunk (bf16 multiply) -------
    dst_scaled = dst_ref[...][None, :, :] * em.astype(jnp.bfloat16)[:, None, :]  # (TB,N,E)
    dst_flat = dst_scaled.reshape(TB * N, E)                                     # (TB*N,E) bf16

    # --- reassociated masked message passing, two flat MXU matmuls -----------
    #   agg_c = (dst ⊙ em_c) @ src_inc @ (x ⊙ fm_c) @ W1
    #         = (((dst ⊙ em_c) @ x_src) ⊙ fm_c) @ W1         (x_src = x[src])
    t = jnp.dot(dst_flat, xsrc_ref[...],
                preferred_element_type=jnp.float32)                 # (TB*N, F) f32
    tm = t.reshape(TB, N, F) * fm[:, None, :]                       # feat mask applied
    agg = jnp.dot(tm.reshape(TB * N, F).astype(jnp.bfloat16), w1_ref[...],
                  preferred_element_type=jnp.float32)               # (TB*N, H) f32
    h = jnp.maximum(agg + b1_ref[...], 0.0)                         # ReLU

    # --- per-candidate mean pool over nodes: one block-diag MXU matmul -------
    pooled = jnp.dot(pool_ref[...], h.astype(jnp.bfloat16),
                     preferred_element_type=jnp.float32)            # (TB, H)
    logits = jnp.dot(pooled.astype(jnp.bfloat16), w2_ref[...],
                     preferred_element_type=jnp.float32) + b2_ref[...]  # (TB, C)

    # --- loss = -model(data)[:, y]  (iota-compare class pick) ----------------
    cls_iota = lax.broadcasted_iota(jnp.int32, (TB, C), 1)
    class_term = -jnp.sum(jnp.where(cls_iota == y_ref[...], logits, 0.0),
                          axis=1, keepdims=True)                    # (TB, 1)

    # --- fused size + entropy regularizers (one lane-reduce per mask) --------
    fm_ent = -fm * jnp.log(fm + EPS) - (1.0 - fm) * jnp.log(1.0 - fm + EPS)
    em_ent = -em * jnp.log(em + EPS) - (1.0 - em) * jnp.log(1.0 - em + EPS)
    fm_reg = jnp.mean(FEAT_MASK_SZ_COEFF * fm + FEAT_MASK_ENT_COEFF * fm_ent,
                      axis=1, keepdims=True)                        # (TB, 1)
    em_reg = jnp.mean(EDGE_MASK_SZ_COEFF * em + EDGE_MASK_ENT_COEFF * em_ent,
                      axis=1, keepdims=True)                        # (TB, 1)

    out_ref[...] = class_term + fm_reg + em_reg


def gnn_explainer_loss(y, x_src_bf, dst_bf, w1_bf, b1, pool_bf, w2_bf, b2,
                       feat_mask, edge_mask, *, tb=16):
    """Batched GNNExplainer loss: one pallas_call, TB candidates per grid step."""
    B, F = feat_mask.shape
    E = edge_mask.shape[1]
    N = dst_bf.shape[0]
    H = w1_bf.shape[1]
    C = w2_bf.shape[1]
    assert B % tb == 0
    n_chunks = B // tb
    y2d = y.reshape(B, 1).astype(jnp.int32)

    shared = lambda i: (0, 0)          # grid-invariant whole-array blocks
    chunk = lambda i: (i, 0)           # per-chunk blocks

    grid_spec = pltpu.PrefetchScalarGridSpec(
        num_scalar_prefetch=0,
        grid=(n_chunks,),
        in_specs=[
            pl.BlockSpec((E, F), shared),            # x_src = x[src]        (bf16)
            pl.BlockSpec((N, E), shared),            # dst incidence         (bf16)
            pl.BlockSpec((F, H), shared),            # w1                    (bf16)
            pl.BlockSpec((1, H), shared),            # b1                    (f32)
            pl.BlockSpec((tb, tb * N), shared),      # block-diag mean-pool  (bf16)
            pl.BlockSpec((H, C), shared),            # w2                    (bf16)
            pl.BlockSpec((1, C), shared),            # b2                    (f32)
            pl.BlockSpec((tb, 1), chunk),            # labels y[chunk]       (i32)
            pl.BlockSpec((tb, F), chunk),            # feat_mask[chunk]      (f32)
            pl.BlockSpec((tb, E), chunk),            # edge_mask[chunk]      (f32)
        ],
        out_specs=pl.BlockSpec((tb, 1), chunk),
    )

    # Advisory cost estimate so XLA overlaps the kernel with surrounding ops.
    flops = 2 * B * N * (E * F + F * H + tb * H) + 2 * B * H * C
    transcendentals = 3 * B * (F + E)
    bytes_accessed = (2 * (E * F + N * E + F * H + tb * tb * N + H * C)   # bf16 shared
                      + 4 * (H + C)                                       # f32 biases
                      + 4 * B * (F + E) + 4 * B + 4 * B)                  # masks + y + out
    cost = pl.CostEstimate(flops=int(flops),
                           transcendentals=int(transcendentals),
                           bytes_accessed=int(bytes_accessed))

    out = pl.pallas_call(
        _gnn_explainer_kernel,
        out_shape=jax.ShapeDtypeStruct((B, 1), jnp.float32),
        grid_spec=grid_spec,
        compiler_params=pltpu.CompilerParams(
            dimension_semantics=("parallel",)),      # chunks shard across v7x TCs
        cost_estimate=cost,
    )(x_src_bf, dst_bf, w1_bf, b1, pool_bf, w2_bf, b2, y2d, feat_mask, edge_mask)
    return out[:, 0]


def reference_loss(y, x_src_bf, dst_bf, w1_bf, b1, w2_bf, b2,
                   feat_mask, edge_mask, N):
    """Plain-JAX reference mirroring the kernel's contraction order / dtypes."""
    fm = jax.nn.sigmoid(feat_mask)                                   # (B, F)
    em = jax.nn.sigmoid(edge_mask)                                   # (B, E)
    dst_scaled = dst_bf[None, :, :] * em.astype(jnp.bfloat16)[:, None, :]  # (B,N,E)
    t = jnp.einsum('bne,ef->bnf', dst_scaled, x_src_bf,
                   preferred_element_type=jnp.float32)               # (B,N,F)
    tm = t * fm[:, None, :]
    agg = jnp.einsum('bnf,fh->bnh', tm.astype(jnp.bfloat16), w1_bf,
                     preferred_element_type=jnp.float32)             # (B,N,H)
    h = jnp.maximum(agg + b1, 0.0)
    pool_row = jnp.full((N,), 1.0 / N, jnp.float32).astype(jnp.bfloat16)
    pooled = jnp.einsum('n,bnh->bh', pool_row, h.astype(jnp.bfloat16),
                        preferred_element_type=jnp.float32)          # (B,H)
    logits = jnp.dot(pooled.astype(jnp.bfloat16), w2_bf,
                     preferred_element_type=jnp.float32) + b2        # (B,C)
    class_term = -jnp.take_along_axis(logits, y[:, None], axis=1)[:, 0]
    fm_ent = -fm * jnp.log(fm + EPS) - (1.0 - fm) * jnp.log(1.0 - fm + EPS)
    em_ent = -em * jnp.log(em + EPS) - (1.0 - em) * jnp.log(1.0 - em + EPS)
    fm_reg = jnp.mean(FEAT_MASK_SZ_COEFF * fm + FEAT_MASK_ENT_COEFF * fm_ent, axis=1)
    em_reg = jnp.mean(EDGE_MASK_SZ_COEFF * em + EDGE_MASK_ENT_COEFF * em_ent, axis=1)
    return class_term + fm_reg + em_reg


if __name__ == "__main__":
    # nodes, feats, edges, hidden, classes, mask candidates, candidates per chunk
    N, F, E, H, C = 16, 16, 128, 128, 8
    B, TB = 64, 16                                   # grid = 4 parallel chunks

    key = jax.random.PRNGKey(0)
    kx, ks, kd, ky, kfm, kem, kw1, kw2 = jax.random.split(key, 8)

    # graph data
    x = jax.random.normal(kx, (N, F), jnp.float32)
    src = jax.random.randint(ks, (E,), 0, N)
    dst = jax.random.randint(kd, (E,), 0, N)
    y = jax.random.randint(ky, (B,), 0, C, dtype=jnp.int32)

    # explainer parameters, one candidate per batch row (mirrors init_mask()):
    #   node_feat_mask ~ Normal(0.1, 0.1), edge_mask ~ randn * relu_gain*sqrt(2/(2N))
    feat_mask = 0.1 + 0.1 * jax.random.normal(kfm, (B, F), jnp.float32)
    std = math.sqrt(2.0) * math.sqrt(2.0 / (N + N))
    edge_mask = jax.random.normal(kem, (B, E), jnp.float32) * std

    # Precomputed graph tensors (built once; sigmoid(edge_mask) / sigmoid(feat_mask)
    # are applied exactly once, inside the kernel):
    #   x_src[e] = x[src[e]]        -- source-feature gather
    #   dst_inc[n, e] = 1 iff dst[e] == n
    x_src_bf = jnp.take(x, src, axis=0).astype(jnp.bfloat16)          # (E, F)
    dst_bf = jax.nn.one_hot(dst, N, dtype=jnp.float32).T.astype(jnp.bfloat16)  # (N, E)

    # synthetic inner GNN weights (deterministic), bf16 operands / f32 accumulate
    w1 = jax.random.normal(kw1, (F, H), jnp.float32) / math.sqrt(F)
    b1 = jnp.zeros((1, H), jnp.float32)
    w2 = jax.random.normal(kw2, (H, C), jnp.float32) / math.sqrt(H)
    b2 = jnp.zeros((1, C), jnp.float32)
    w1_bf = w1.astype(jnp.bfloat16)
    w2_bf = w2.astype(jnp.bfloat16)

    # block-diagonal mean-pool matrix: pooled = kron(I_TB, ones(1,N)/N) @ h_stack
    pool_bf = jnp.kron(jnp.eye(TB, dtype=jnp.float32),
                       jnp.full((1, N), 1.0 / N, jnp.float32)).astype(jnp.bfloat16)

    losses = gnn_explainer_loss(y, x_src_bf, dst_bf, w1_bf, b1, pool_bf,
                                w2_bf, b2, feat_mask, edge_mask, tb=TB)
    losses = jax.block_until_ready(losses)

    ref = reference_loss(y, x_src_bf, dst_bf, w1_bf, b1, w2_bf, b2,
                         feat_mask, edge_mask, N)
    assert losses.shape == (B,)
    assert jnp.allclose(losses, ref, rtol=5e-3, atol=1e-3), (losses, ref)

    print("KERNEL_OK")
</pallas_src>

<mosaic_0001>
module attributes {stable_mosaic.version = 11 : i64} {
  func.func @_gnn_explainer_kernel(%arg0: i32, %arg1: memref<128x16xbf16, #tpu.memory_space<vmem>>, %arg2: memref<16x128xbf16, #tpu.memory_space<vmem>>, %arg3: memref<16x128xbf16, #tpu.memory_space<vmem>>, %arg4: memref<1x128xf32, #tpu.memory_space<vmem>>, %arg5: memref<16x256xbf16, #tpu.memory_space<vmem>>, %arg6: memref<128x8xbf16, #tpu.memory_space<vmem>>, %arg7: memref<1x8xf32, #tpu.memory_space<vmem>>, %arg8: memref<16x1xi32, #tpu.memory_space<vmem>>, %arg9: memref<16x16xf32, #tpu.memory_space<vmem>>, %arg10: memref<16x128xf32, #tpu.memory_space<vmem>>, %arg11: memref<16x1xf32, #tpu.memory_space<vmem>>) attributes {dimension_semantics = [#tpu.dimension_semantics<parallel>], iteration_bounds = array<i64: 4>, scalar_prefetch = 0 : i64, scratch_operands = 0 : i64, tpu.core_type = #tpu.core_type<tc>, window_params = [{pipeline_mode = #tpu.pipeline_mode<synchronous>, transform_indices = @transform_0, window_bounds = array<i64: 128, 16>}, {pipeline_mode = #tpu.pipeline_mode<synchronous>, transform_indices = @transform_1, window_bounds = array<i64: 16, 128>}, {pipeline_mode = #tpu.pipeline_mode<synchronous>, transform_indices = @transform_2, window_bounds = array<i64: 16, 128>}, {pipeline_mode = #tpu.pipeline_mode<synchronous>, transform_indices = @transform_3, window_bounds = array<i64: 1, 128>}, {pipeline_mode = #tpu.pipeline_mode<synchronous>, transform_indices = @transform_4, window_bounds = array<i64: 16, 256>}, {pipeline_mode = #tpu.pipeline_mode<synchronous>, transform_indices = @transform_5, window_bounds = array<i64: 128, 8>}, {pipeline_mode = #tpu.pipeline_mode<synchronous>, transform_indices = @transform_6, window_bounds = array<i64: 1, 8>}, {transform_indices = @transform_7, window_bounds = array<i64: 16, 1>}, {transform_indices = @transform_8, window_bounds = array<i64: 16, 16>}, {transform_indices = @transform_9, window_bounds = array<i64: 16, 128>}, {transform_indices = @transform_10, window_bounds = array<i64: 16, 1>}]} {
    %c0 = arith.constant 0 : index
    %c0_0 = arith.constant 0 : index
    %0 = vector.load %arg9[%c0, %c0_0] : memref<16x16xf32, #tpu.memory_space<vmem>>, vector<16x16xf32>
    %1 = arith.negf %0 : vector<16x16xf32>
    %2 = math.exp %1 : vector<16x16xf32>
    %cst = arith.constant 1.000000e+00 : f32
    %3 = vector.broadcast %cst : f32 to vector<16x16xf32>
    %4 = arith.addf %3, %2 : vector<16x16xf32>
    %5 = arith.divf %3, %4 : vector<16x16xf32>
    %c0_1 = arith.constant 0 : index
    %c0_2 = arith.constant 0 : index
    %6 = vector.load %arg10[%c0_1, %c0_2] : memref<16x128xf32, #tpu.memory_space<vmem>>, vector<16x128xf32>
    %7 = arith.negf %6 : vector<16x128xf32>
    %8 = math.exp %7 : vector<16x128xf32>
    %cst_3 = arith.constant 1.000000e+00 : f32
    %9 = vector.broadcast %cst_3 : f32 to vector<16x128xf32>
    %10 = arith.addf %9, %8 : vector<16x128xf32>
    %11 = arith.divf %9, %10 : vector<16x128xf32>
    %c0_4 = arith.constant 0 : index
    %c0_5 = arith.constant 0 : index
    %12 = vector.load %arg2[%c0_4, %c0_5] : memref<16x128xbf16, #tpu.memory_space<vmem>>, vector<16x128xbf16>
    %13 = vector.shape_cast %12 : vector<16x128xbf16> to vector<1x16x128xbf16>
    %14 = arith.truncf %11 : vector<16x128xf32> to vector<16x128xbf16>
    %15 = vector.shape_cast %14 : vector<16x128xbf16> to vector<16x1x128xbf16>
    %16 = vector.broadcast %13 : vector<1x16x128xbf16> to vector<16x16x128xbf16>
    %17 = vector.broadcast %15 : vector<16x1x128xbf16> to vector<16x16x128xbf16>
    %18 = arith.mulf %16, %17 : vector<16x16x128xbf16>
    %19 = vector.shape_cast %18 : vector<16x16x128xbf16> to vector<256x128xbf16>
    %c0_6 = arith.constant 0 : index
    %c0_7 = arith.constant 0 : index
    %20 = vector.load %arg1[%c0_6, %c0_7] : memref<128x16xbf16, #tpu.memory_space<vmem>>, vector<128x16xbf16>
    %cst_8 = arith.constant dense<0.000000e+00> : vector<256x16xf32>
    %21 = tpu.matmul %19, %20, %cst_8 {dimension_numbers = #tpu.dot_dimension_numbers<[1], [0], [0], [1], [0, 0, 1, 1], [], []>} : vector<256x128xbf16>, vector<128x16xbf16>, vector<256x16xf32> -> vector<256x16xf32>
    %22 = vector.shape_cast %21 : vector<256x16xf32> to vector<16x16x16xf32>
    %23 = vector.shape_cast %5 : vector<16x16xf32> to vector<16x1x16xf32>
    %24 = vector.broadcast %23 : vector<16x1x16xf32> to vector<16x16x16xf32>
    %25 = arith.mulf %22, %24 : vector<16x16x16xf32>
    %26 = vector.shape_cast %25 : vector<16x16x16xf32> to vector<256x16xf32>
    %27 = arith.truncf %26 : vector<256x16xf32> to vector<256x16xbf16>
    %c0_9 = arith.constant 0 : index
    %c0_10 = arith.constant 0 : index
    %28 = vector.load %arg3[%c0_9, %c0_10] : memref<16x128xbf16, #tpu.memory_space<vmem>>, vector<16x128xbf16>
    %cst_11 = arith.constant dense<0.000000e+00> : vector<256x128xf32>
    %29 = tpu.matmul %27, %28, %cst_11 {dimension_numbers = #tpu.dot_dimension_numbers<[1], [0], [0], [1], [0, 0, 1, 1], [], []>} : vector<256x16xbf16>, vector<16x128xbf16>, vector<256x128xf32> -> vector<256x128xf32>
    %c0_12 = arith.constant 0 : index
    %c0_13 = arith.constant 0 : index
    %30 = vector.load %arg4[%c0_12, %c0_13] : memref<1x128xf32, #tpu.memory_space<vmem>>, vector<1x128xf32>
    %31 = vector.broadcast %30 : vector<1x128xf32> to vector<256x128xf32>
    %32 = arith.addf %29, %31 : vector<256x128xf32>
    %cst_14 = arith.constant 0.000000e+00 : f32
    %33 = vector.broadcast %cst_14 : f32 to vector<256x128xf32>
    %34 = arith.maximumf %32, %33 : vector<256x128xf32>
    %c0_15 = arith.constant 0 : index
    %c0_16 = arith.constant 0 : index
    %35 = vector.load %arg5[%c0_15, %c0_16] : memref<16x256xbf16, #tpu.memory_space<vmem>>, vector<16x256xbf16>
    %36 = arith.truncf %34 : vector<256x128xf32> to vector<256x128xbf16>
    %cst_17 = arith.constant dense<0.000000e+00> : vector<16x128xf32>
    %37 = tpu.matmul %35, %36, %cst_17 {dimension_numbers = #tpu.dot_dimension_numbers<[1], [0], [0], [1], [0, 0, 1, 1], [], []>} : vector<16x256xbf16>, vector<256x128xbf16>, vector<16x128xf32> -> vector<16x128xf32>
    %38 = arith.truncf %37 : vector<16x128xf32> to vector<16x128xbf16>
    %c0_18 = arith.constant 0 : index
    %c0_19 = arith.constant 0 : index
    %39 = vector.load %arg6[%c0_18, %c0_19] : memref<128x8xbf16, #tpu.memory_space<vmem>>, vector<128x8xbf16>
    %cst_20 = arith.constant dense<0.000000e+00> : vector<16x8xf32>
    %40 = tpu.matmul %38, %39, %cst_20 {dimension_numbers = #tpu.dot_dimension_numbers<[1], [0], [0], [1], [0, 0, 1, 1], [], []>} : vector<16x128xbf16>, vector<128x8xbf16>, vector<16x8xf32> -> vector<16x8xf32>
    %c0_21 = arith.constant 0 : index
    %c0_22 = arith.constant 0 : index
    %41 = vector.load %arg7[%c0_21, %c0_22] : memref<1x8xf32, #tpu.memory_space<vmem>>, vector<1x8xf32>
    %42 = vector.broadcast %41 : vector<1x8xf32> to vector<16x8xf32>
    %43 = arith.addf %40, %42 : vector<16x8xf32>
    %44 = tpu.iota {dimensions = array<i32: 1>} : vector<16x8xi32>
    %c0_23 = arith.constant 0 : index
    %c0_24 = arith.constant 0 : index
    %45 = vector.load %arg8[%c0_23, %c0_24] : memref<16x1xi32, #tpu.memory_space<vmem>>, vector<16x1xi32>
    %46 = vector.broadcast %45 : vector<16x1xi32> to vector<16x8xi32>
    %47 = arith.cmpi eq, %44, %46 : vector<16x8xi32>
    %cst_25 = arith.constant 0.000000e+00 : f32
    %48 = vector.broadcast %cst_25 : f32 to vector<16x8xf32>
    %49 = arith.select %47, %43, %48 : vector<16x8xi1>, vector<16x8xf32>
    %cst_26 = arith.constant dense<0.000000e+00> : vector<16xf32>
    %50 = vector.multi_reduction <add>, %49, %cst_26 [1] : vector<16x8xf32> to vector<16xf32>
    %51 = vector.shape_cast %50 : vector<16xf32> to vector<16x1xf32>
    %cst_27 = arith.constant 0.000000e+00 : f32
    %52 = vector.broadcast %cst_27 : f32 to vector<16x1xf32>
    %53 = arith.subf %52, %51 : vector<16x1xf32>
    %cst_28 = arith.constant 0.000000e+00 : f32
    %54 = vector.broadcast %cst_28 : f32 to vector<16x16xf32>
    %55 = arith.subf %54, %5 : vector<16x16xf32>
    %cst_29 = arith.constant 1.000000e-15 : f32
    %56 = vector.broadcast %cst_29 : f32 to vector<16x16xf32>
    %57 = arith.addf %5, %56 : vector<16x16xf32>
    %58 = math.log %57 : vector<16x16xf32>
    %59 = arith.mulf %55, %58 : vector<16x16xf32>
    %cst_30 = arith.constant 1.000000e+00 : f32
    %60 = vector.broadcast %cst_30 : f32 to vector<16x16xf32>
    %61 = arith.subf %60, %5 : vector<16x16xf32>
    %cst_31 = arith.constant 1.000000e+00 : f32
    %62 = vector.broadcast %cst_31 : f32 to vector<16x16xf32>
    %63 = arith.subf %62, %5 : vector<16x16xf32>
    %cst_32 = arith.constant 1.000000e-15 : f32
    %64 = vector.broadcast %cst_32 : f32 to vector<16x16xf32>
    %65 = arith.addf %63, %64 : vector<16x16xf32>
    %66 = math.log %65 : vector<16x16xf32>
    %67 = arith.mulf %61, %66 : vector<16x16xf32>
    %68 = arith.subf %59, %67 : vector<16x16xf32>
    %cst_33 = arith.constant 0.000000e+00 : f32
    %69 = vector.broadcast %cst_33 : f32 to vector<16x128xf32>
    %70 = arith.subf %69, %11 : vector<16x128xf32>
    %cst_34 = arith.constant 1.000000e-15 : f32
    %71 = vector.broadcast %cst_34 : f32 to vector<16x128xf32>
    %72 = arith.addf %11, %71 : vector<16x128xf32>
    %73 = math.log %72 : vector<16x128xf32>
    %74 = arith.mulf %70, %73 : vector<16x128xf32>
    %cst_35 = arith.constant 1.000000e+00 : f32
    %75 = vector.broadcast %cst_35 : f32 to vector<16x128xf32>
    %76 = arith.subf %75, %11 : vector<16x128xf32>
    %cst_36 = arith.constant 1.000000e+00 : f32
    %77 = vector.broadcast %cst_36 : f32 to vector<16x128xf32>
    %78 = arith.subf %77, %11 : vector<16x128xf32>
    %cst_37 = arith.constant 1.000000e-15 : f32
    %79 = vector.broadcast %cst_37 : f32 to vector<16x128xf32>
    %80 = arith.addf %78, %79 : vector<16x128xf32>
    %81 = math.log %80 : vector<16x128xf32>
    %82 = arith.mulf %76, %81 : vector<16x128xf32>
    %83 = arith.subf %74, %82 : vector<16x128xf32>
    %cst_38 = arith.constant 1.000000e-01 : f32
    %84 = vector.broadcast %cst_38 : f32 to vector<16x16xf32>
    %85 = arith.mulf %84, %5 : vector<16x16xf32>
    %cst_39 = arith.constant 1.000000e-01 : f32
    %86 = vector.broadcast %cst_39 : f32 to vector<16x16xf32>
    %87 = arith.mulf %86, %68 : vector<16x16xf32>
    %88 = arith.addf %85, %87 : vector<16x16xf32>
    %cst_40 = arith.constant dense<0.000000e+00> : vector<16xf32>
    %89 = vector.multi_reduction <add>, %88, %cst_40 [1] : vector<16x16xf32> to vector<16xf32>
    %90 = vector.shape_cast %89 : vector<16xf32> to vector<16x1xf32>
    %cst_41 = arith.constant 1.600000e+01 : f32
    %91 = vector.broadcast %cst_41 : f32 to vector<16x1xf32>
    %92 = arith.divf %90, %91 : vector<16x1xf32>
    %cst_42 = arith.constant 5.000000e-01 : f32
    %93 = vector.broadcast %cst_42 : f32 to vector<16x128xf32>
    %94 = arith.mulf %93, %11 : vector<16x128xf32>
    %cst_43 = arith.constant 1.000000e+00 : f32
    %95 = vector.broadcast %cst_43 : f32 to vector<16x128xf32>
    %96 = arith.mulf %95, %83 : vector<16x128xf32>
    %97 = arith.addf %94, %96 : vector<16x128xf32>
    %cst_44 = arith.constant dense<0.000000e+00> : vector<16xf32>
    %98 = vector.multi_reduction <add>, %97, %cst_44 [1] : vector<16x128xf32> to vector<16xf32>
    %99 = vector.shape_cast %98 : vector<16xf32> to vector<16x1xf32>
    %cst_45 = arith.constant 1.280000e+02 : f32
    %100 = vector.broadcast %cst_45 : f32 to vector<16x1xf32>
    %101 = arith.divf %99, %100 : vector<16x1xf32>
    %102 = arith.addf %53, %92 : vector<16x1xf32>
    %103 = arith.addf %102, %101 : vector<16x1xf32>
    %c0_46 = arith.constant 0 : index
    %c0_47 = arith.constant 0 : index
    %104 = vector.load %arg11[%c0_46, %c0_47] : memref<16x1xf32, #tpu.memory_space<vmem>>, vector<16x1xf32>
    tpu.vector_store %arg11[%c0_46, %c0_47], %103 {strides = array<i32>} : memref<16x1xf32, #tpu.memory_space<vmem>>, vector<16x1xf32>,
    return
  }
  func.func @transform_0(%arg0: i32) -> (i32, i32) {
    %c0_i32 = arith.constant 0 : i32
    %c0_i32_0 = arith.constant 0 : i32
    %c0_i32_1 = arith.constant 0 : i32
    return %c0_i32, %c0_i32_0 : i32, i32
  }
  func.func @transform_1(%arg0: i32) -> (i32, i32) {
    %c0_i32 = arith.constant 0 : i32
    %c0_i32_0 = arith.constant 0 : i32
    %c0_i32_1 = arith.constant 0 : i32
    return %c0_i32, %c0_i32_0 : i32, i32
  }
  func.func @transform_2(%arg0: i32) -> (i32, i32) {
    %c0_i32 = arith.constant 0 : i32
    %c0_i32_0 = arith.constant 0 : i32
    %c0_i32_1 = arith.constant 0 : i32
    return %c0_i32, %c0_i32_0 : i32, i32
  }
  func.func @transform_3(%arg0: i32) -> (i32, i32) {
    %c0_i32 = arith.constant 0 : i32
    %c0_i32_0 = arith.constant 0 : i32
    %c0_i32_1 = arith.constant 0 : i32
    return %c0_i32, %c0_i32_0 : i32, i32
  }
  func.func @transform_4(%arg0: i32) -> (i32, i32) {
    %c0_i32 = arith.constant 0 : i32
    %c0_i32_0 = arith.constant 0 : i32
    %c0_i32_1 = arith.constant 0 : i32
    return %c0_i32, %c0_i32_0 : i32, i32
  }
  func.func @transform_5(%arg0: i32) -> (i32, i32) {
    %c0_i32 = arith.constant 0 : i32
    %c0_i32_0 = arith.constant 0 : i32
    %c0_i32_1 = arith.constant 0 : i32
    return %c0_i32, %c0_i32_0 : i32, i32
  }
  func.func @transform_6(%arg0: i32) -> (i32, i32) {
    %c0_i32 = arith.constant 0 : i32
    %c0_i32_0 = arith.constant 0 : i32
    %c0_i32_1 = arith.constant 0 : i32
    return %c0_i32, %c0_i32_0 : i32, i32
  }
  func.func @transform_7(%arg0: i32) -> (i32, i32) {
    %c0_i32 = arith.constant 0 : i32
    %c0_i32_0 = arith.constant 0 : i32
    return %arg0, %c0_i32 : i32, i32
  }
  func.func @transform_8(%arg0: i32) -> (i32, i32) {
    %c0_i32 = arith.constant 0 : i32
    %c0_i32_0 = arith.constant 0 : i32
    return %arg0, %c0_i32 : i32, i32
  }
  func.func @transform_9(%arg0: i32) -> (i32, i32) {
    %c0_i32 = arith.constant 0 : i32
    %c0_i32_0 = arith.constant 0 : i32
    return %arg0, %c0_i32 : i32, i32
  }
  func.func @transform_10(%arg0: i32) -> (i32, i32) {
    %c0_i32 = arith.constant 0 : i32
    %c0_i32_0 = arith.constant 0 : i32
    return %arg0, %c0_i32 : i32, i32
  }
}

</mosaic_0001>

<bundles_post_ra>
// kernel: tpu_custom_call.1
= control target key start
LH: loop header
LB: loop body
LE: loop exit
PB: predicated region body
PF: predicated region fallthrough
CT: control target
= control target key end

     0   :  { %s2364_s13 = smov 0   ;;  %s2691_s0 = inlined_call_operand.vmem [shape: bf16[128,16], index: 0, kind: input, shape index: {}]   ;;  %s2692_s1 = inlined_call_operand.vmem [shape: bf16[16,128], index: 1, kind: input, shape index: {}]   ;;  %s2693_s2 = inlined_call_operand.vmem [shape: bf16[16,128], index: 2, kind: input, shape index: {}]   ;;  %s2694_s3 = inlined_call_operand.vmem [shape: f32[1,128], index: 3, kind: input, shape index: {}]   ;;  %s2695_s4 = inlined_call_operand.vmem [shape: bf16[16,256], index: 4, kind: input, shape index: {}]   ;;  %s2696_s5 = inlined_call_operand.vmem [shape: bf16[128,8], index: 5, kind: input, shape index: {}]   ;;  %s2697_s6 = inlined_call_operand.vmem [shape: f32[1,8], index: 6, kind: input, shape index: {}]   ;;  %s2698_s7 = inlined_call_operand.vmem [shape: s32[64,1], index: 7, kind: input, shape index: {}]   ;;  %s2699_s8 = inlined_call_operand.vmem [shape: f32[64,16], index: 8, kind: input, shape index: {}]   ;;  %s2700_s9 = inlined_call_operand.vmem [shape: f32[64,128], index: 9, kind: input, shape index: {}]   ;;  %s2701_s10 = inlined_call_operand.vmem [shape: f32[64,1], index: 10, kind: output, shape index: {}]  }
   0x1 LB: > { %s1961_s14 = sadd.s32 4294967295, %s2303_s13   ;;  %p1965_p0 = scmp.ge.s32.totalorder %s2303_s13, 1  ;;  %s2303_s13 = sphi %s2364_s13, %s20_s13  }
   0x2   : > { %p335_p1 = scmp.lt.s32.totalorder %s2303_s13, 5 }
   0x4   : > { %p336_p2 = pnand %p1965_p0, %p335_p1 }
   0x5   : > { %s1966_s17 = sshll.u32 (!%p336_p2), %s1961_s14, 1 }
   0x6   : > { %339 = sbr.rel (%p336_p2) target bundleno = 1120 (0x460), region = 60  ;;  %p384_p3 = scmp.lt.s32.totalorder (!%p336_p2), %s1966_s17, 7 }
   0xb   : > { %v2245_v0 = vld [vmem:[%s2691_s0 + $0x38] sm:$0xff]   ;;  %v2246_v1 = vld [vmem:[%s2691_s0 + $0x30] sm:$0xff]   ;;  %s2703_s17 = smov (!%p384_p3, %s1966_s17), 7  ;;  %v2247_v2 = vld [vmem:[%s2691_s0 + $0x28] sm:$0xff]   ;;  %v2305_v16 = vmov 1966171168   ;;  %v444_v18 = vlaneseq }
   0xc   : > { %2130 = vmatprep.subr.bf16.mxu0 %v2245_v0  ;;  %s2381_s22 = sshll.u32 %s2703_s17, 3  ;;  %v2248_v3 = vld [vmem:[%s2691_s0 + $0x20] sm:$0xff]   ;;  %v2249_v8 = vld [vmem:[%s2691_s0 + $0x18] sm:$0xff]   ;;  %v2250_v9 = vld [vmem:[%s2691_s0 + $0x10] sm:$0xff]   ;;  %v442_v17 = vunpack.c.l.s4 %v2305_v16  ;;  %vm1357_vm0 = vcmask 130048   ;;  %vm2307_vm1 = vmmov 0  }
   0xd   : > { %2131 = vmatpush3.bf16.msra.mxu0 %v2245_v0  ;;  %s399_s25 = scalar_lea.vmem %s2700_s9, %s2381_s22  ;;  %v2251_v10 = vld [vmem:[%s2691_s0 + $0x8] sm:$0xff]   ;;  %v2252_v11 = vld [vmem:[%s2691_s0] sm:$0xff]   ;;  %v445_v20 = vshrl.u32 %v444_v18, 7  ;;  %s393_s26 = scalar_lea.vmem %s2699_s8, %s2381_s22  ;;  %vm1795_vm3 = vcmask 64512   ;;  %vm1878_vm5 = vcmask 7168  }
   0xe   : > { %2132 = vmatprep.subr.bf16.mxu0 %v2246_v1  ;;  %v422_v4 = vld [vmem:[%s399_s25] sm:$0xff]  ;;  %v423_v5 = vld [vmem:[%s399_s25 + $0x8] sm:$0xff]  ;;  %v443_v19 = vunpack.c.0.s8 %v442_v17  ;;  %s387_s14 = scalar_lea.vmem %s2698_s7, %s2381_s22  ;;  %s405_s19 = scalar_lea.vmem %s2701_s10, %s2381_s22 }
   0xf   : > { %v1976_v6 = vmul.f32 -1.442695, %v422_v4  ;;  %v1977_v7 = vmul.f32 -1.442695, %v423_v5  ;;  %v2413_v28 = vsub.s32 0, %v445_v20 }
  0x10   : > { %v2405_v22 = vsub.s32 %v443_v19, %v445_v20  ;;  %v2428_v53 = vld [vmem:[%s2692_s1] sm:$0xf]  ;;  %v2433_v54 = vld [vmem:[%s2692_s1 + $0x4] sm:$0xf] }
  0x11   : > { %2133 = vmatpush3.bf16.msra.mxu0 %v2246_v1  ;;  %2265 = vpow2.f32 %v1976_v6 }
  0x12   : > { %2134 = vmatprep.subr.bf16.mxu0 %v2247_v2  ;;  %2267 = vpow2.f32 %v1977_v7 }
  0x15   : > { %2135 = vmatpush3.bf16.msra.mxu0 %v2247_v2 }
  0x16   : > { %2136 = vmatprep.subr.bf16.mxu0 %v2248_v3 }
  0x19   : > { %2137 = vmatpush3.bf16.msra.mxu0 %v2248_v3 }
  0x1a   : > { %2138 = vmatprep.subr.bf16.mxu0 %v2249_v8 }
  0x1d   : > { %2139 = vmatpush3.bf16.msra.mxu0 %v2249_v8 }
  0x1e   : > { %2140 = vmatprep.subr.bf16.mxu0 %v2250_v9  ;;  %v2266_v12 = vpop.eup %2265 }
  0x1f   : > { %v2268_v13 = vpop.eup %2267  ;;  %v430_v14 = vadd.f32 1.0, %v2266_v12 }
  0x20   : > { %v431_v15 = vadd.f32 1.0, %v2268_v13 }
  0x21   : > { %2141 = vmatpush3.bf16.msra.mxu0 %v2250_v9  ;;  %2269 = vrcp.f32 %v430_v14 }
  0x22   : > { %2142 = vmatprep.subr.bf16.mxu0 %v2251_v10  ;;  %2271 = vrcp.f32 %v431_v15 }
  0x25   : > { %2143 = vmatpush3.bf16.msra.mxu0 %v2251_v10 }
  0x26   : > { %2144 = vmatprep.subr.bf16.mxu0 %v2252_v11 }
  0x29   : > { %2145 = vmatpush3.bf16.msra.mxu0 %v2252_v11 }
  0x2e   : > { %v2403_v21 = vpop.eup %2269 }
  0x2f   : > { %v2407_v23 = vpop.eup %2271 }
  0x30   : > { %v438_v24 = vpack.c.bf16 %v2407_v23, %v2403_v21  ;;  %v1978_v29 = vpack.c.bf16 %v2407_v23, %v2407_v23 }
  0x32   : > { %v447_v25 = vrot.slane %v438_v24, %v2405_v22  ;;  %v454_v41 = vrot.slane %v1978_v29, %v2405_v22 }
  0x34   : > { %v455_v26 = vcombine.high %v447_v25, %v447_v25  ;;  %v463_v27 = vrot.slane %v447_v25, %v2405_v22  ;;  %v470_v58 = vrot.slane %v454_v41, %v2405_v22  ;;  %v456_v1 = vcombine.high %v454_v41, %v454_v41 }
  0x36   : > { %v1979_v30 = vpack.i.b16 %v463_v27, %v463_v27  ;;  %v490_v31 = vunpack.i.h.s16 %v463_v27  ;;  %v477_v32 = vrot.slane %v455_v26, %v2405_v22  ;;  %v485_v33 = vcombine.high %v463_v27, %v463_v27 }
  0x37   : > { %v1983_v9 = vpack.i.b16 %v470_v58, %v470_v58  ;;  %v498_v25 = vunpack.i.h.s16 %v470_v58 }
  0x38   : > { %v524_v34 = vrot.slane %v1979_v30, %v2413_v28  ;;  %v506_v35 = vpack.i.b16 %v490_v31, %v490_v31  ;;  %v1980_v36 = vpack.i.b16 %v477_v32, %v477_v32  ;;  %v492_v37 = vunpack.i.h.s16 %v477_v32 }
  0x39   : > { %v1981_v38 = vpack.i.b16 %v485_v33, %v485_v33  ;;  %v494_v39 = vunpack.i.h.s16 %v485_v33  ;;  %v487_v40 = vcombine.high %v477_v32, %v477_v32  ;;  %v484_v30 = vrot.slane %v456_v1, %v2405_v22 }
  0x3a   : > { %v586_v42 = vpack.i.b16 %v524_v34, %v524_v34  ;;  %v528_v43 = vrot.slane %v506_v35, %v2413_v28  ;;  %v532_v44 = vrot.slane %v1980_v36, %v2413_v28  ;;  %v508_v45 = vpack.i.b16 %v492_v37, %v492_v37 }
  0x3b   : > { %v540_v46 = vrot.slane %v1981_v38, %v2413_v28  ;;  %v510_v47 = vpack.i.b16 %v494_v39, %v494_v39  ;;  %v1982_v48 = vpack.i.b16 %v487_v40, %v487_v40  ;;  %v496_v57 = vunpack.i.h.s16 %v487_v40 }
  0x3c   : > { %v591_v49 = vrot.slane %v586_v42, %v2413_v28  ;;  %v593_v50 = vpack.i.b16 %v528_v43, %v528_v43  ;;  %v600_v51 = vpack.i.b16 %v532_v44, %v532_v44  ;;  %v536_v52 = vrot.slane %v508_v45, %v2413_v28 }
  0x3d   : > { %v614_v55 = vpack.i.b16 %v540_v46, %v540_v46  ;;  %v544_v56 = vrot.slane %v510_v47, %v2413_v28  ;;  %v548_v0 = vrot.slane %v1982_v48, %v2413_v28  ;;  %v512_v8 = vpack.i.b16 %v496_v57, %v496_v57 }
  0x3e   : > { %v1987_v59 = vcombine.low %v591_v49, %v591_v49  ;;  %v598_v60 = vrot.slane %v593_v50, %v2413_v28  ;;  %v605_v61 = vrot.slane %v600_v51, %v2413_v28  ;;  %v607_v62 = vpack.i.b16 %v536_v52, %v536_v52 }
  0x3f   : > { %v619_v63 = vrot.slane %v614_v55, %v2413_v28  ;;  %v621_v7 = vpack.i.b16 %v544_v56, %v544_v56  ;;  %v628_v17 = vpack.i.b16 %v548_v0, %v548_v0  ;;  %v552_v29 = vrot.slane %v512_v8, %v2413_v28 }
  0x40   : > { %v761_v2 = vmul.bf16 %v1987_v59, %v2428_v53  ;;  %v762_v3 = vmul.bf16 %v1987_v59, %v2433_v54  ;;  %v1988_v4 = vcombine.low %v598_v60, %v598_v60  ;;  %v1989_v5 = vcombine.low %v605_v61, %v605_v61 }
  0x41   : > { %v612_v6 = vrot.slane %v607_v62, %v2413_v28  ;;  %v1991_v16 = vcombine.low %v619_v63, %v619_v63  ;;  %v626_v24 = vrot.slane %v621_v7, %v2413_v28  ;;  %v633_v33 = vrot.slane %v628_v17, %v2413_v28 }
  0x42   : > { %v2003_v10 = vcombine.low %v761_v2, %v762_v3  ;;  %v763_v11 = vmul.bf16 %v1988_v4, %v2428_v53  ;;  %v764_v12 = vmul.bf16 %v1988_v4, %v2433_v54  ;;  %v765_v13 = vmul.bf16 %v1989_v5, %v2428_v53 }
  0x43   : > { %v766_v14 = vmul.bf16 %v1989_v5, %v2433_v54  ;;  %v1990_v15 = vcombine.low %v612_v6, %v612_v6  ;;  %v769_v31 = vmul.bf16 %v1991_v16, %v2428_v53  ;;  %v770_v32 = vmul.bf16 %v1991_v16, %v2433_v54 }
  0x44   : > { %2146 = vmatprep.mubr.bf16.mxu0 %v2003_v10  ;;  %v2004_v19 = vcombine.low %v763_v11, %v764_v12  ;;  %v556_v34 = vrot.slane %v1983_v9, %v2413_v28  ;;  %v1992_v35 = vcombine.low %v626_v24, %v626_v24  ;;  %v635_v37 = vpack.i.b16 %v552_v29, %v552_v29 }
  0x45   : > { %v2005_v20 = vcombine.low %v765_v13, %v766_v14  ;;  %v767_v26 = vmul.bf16 %v1990_v15, %v2428_v53  ;;  %v768_v27 = vmul.bf16 %v1990_v15, %v2433_v54  ;;  %v514_v38 = vpack.i.b16 %v498_v25, %v498_v25 }
  0x46   : > { %2147 = vmatmul.mubr.bf16.vlgmr.msra.gmra.mxu0 %v2004_v19  ;;  %v2007_v39 = vcombine.low %v769_v31, %v770_v32  ;;  %v1993_v40 = vcombine.low %v633_v33, %v633_v33  ;;  %v642_v41 = vpack.i.b16 %v556_v34, %v556_v34  ;;  %v1984_v42 = vpack.i.b16 %v484_v30, %v484_v30 }
  0x47   : > { %2150 = vmatprep.mubr.bf16.mxu0 %v2005_v20  ;;  %v2006_v36 = vcombine.low %v767_v26, %v768_v27  ;;  %v771_v43 = vmul.bf16 %v1992_v35, %v2428_v53  ;;  %v486_v44 = vcombine.high %v470_v58, %v470_v58  ;;  %v772_v45 = vmul.bf16 %v1992_v35, %v2433_v54 }
  0x48   : > { %v640_v46 = vrot.slane %v635_v37, %v2413_v28  ;;  %v560_v47 = vrot.slane %v514_v38, %v2413_v28  ;;  %v500_v48 = vunpack.i.h.s16 %v484_v30  ;;  %v773_v49 = vmul.bf16 %v1993_v40, %v2428_v53 }
  0x49   : > { %v774_v50 = vmul.bf16 %v1993_v40, %v2433_v54  ;;  %v647_v51 = vrot.slane %v642_v41, %v2413_v28  ;;  %v564_v52 = vrot.slane %v1984_v42, %v2413_v28  ;;  %v2008_v55 = vcombine.low %v771_v43, %v772_v45 }
  0x4a   : > { %v1994_v56 = vcombine.low %v640_v46, %v640_v46  ;;  %v649_v57 = vpack.i.b16 %v560_v47, %v560_v47  ;;  %v516_v58 = vpack.i.b16 %v500_v48, %v500_v48  ;;  %v1985_v62 = vpack.i.b16 %v486_v44, %v486_v44 }
  0x4b   : > { %v2009_v59 = vcombine.low %v773_v49, %v774_v50  ;;  %v1995_v60 = vcombine.low %v647_v51, %v647_v51  ;;  %v656_v61 = vpack.i.b16 %v564_v52, %v564_v52  ;;  %v502_v63 = vunpack.i.h.s16 %v486_v44 }
  0x4c   : > { %v488_v0 = vcombine.high %v484_v30, %v484_v30  ;;  %v775_v1 = vmul.bf16 %v1994_v56, %v2428_v53  ;;  %v776_v2 = vmul.bf16 %v1994_v56, %v2433_v54  ;;  %v654_v3 = vrot.slane %v649_v57, %v2413_v28 }
  0x4d   : > { %v568_v4 = vrot.slane %v516_v58, %v2413_v28  ;;  %v777_v5 = vmul.bf16 %v1995_v60, %v2428_v53  ;;  %v778_v6 = vmul.bf16 %v1995_v60, %v2433_v54  ;;  %v661_v7 = vrot.slane %v656_v61, %v2413_v28 }
  0x4e   : > { %2151 = vmatmul.mubr.bf16.gmra.mxu0 %v2006_v36  ;;  %v572_v8 = vrot.slane %v1985_v62, %v2413_v28  ;;  %v518_v9 = vpack.i.b16 %v502_v63, %v502_v63  ;;  %v2010_v10 = vcombine.low %v775_v1, %v776_v2  ;;  %v1996_v11 = vcombine.low %v654_v3, %v654_v3  ;;  %v2253_v63 = vld [vmem:[%s2693_s2] sm:$0xff]  }
  0x4f   : > { %2154 = vmatprep.mubr.bf16.mxu0 %v2007_v39  ;;  %v663_v12 = vpack.i.b16 %v568_v4, %v568_v4  ;;  %v2011_v13 = vcombine.low %v777_v5, %v778_v6  ;;  %v1997_v14 = vcombine.low %v661_v7, %v661_v7  ;;  %v1986_v16 = vpack.i.b16 %v488_v0, %v488_v0 }
  0x50   : > { %v670_v15 = vpack.i.b16 %v572_v8, %v572_v8  ;;  %v576_v17 = vrot.slane %v518_v9, %v2413_v28  ;;  %v779_v19 = vmul.bf16 %v1996_v11, %v2428_v53  ;;  %v780_v20 = vmul.bf16 %v1996_v11, %v2433_v54  ;;  %2178 = vmatprep.subr.bf16.mxu1 %v2253_v63 }
  0x51   : > { %v668_v24 = vrot.slane %v663_v12, %v2413_v28  ;;  %v504_v25 = vunpack.i.h.s16 %v488_v0  ;;  %v781_v26 = vmul.bf16 %v1997_v14, %v2428_v53  ;;  %v782_v27 = vmul.bf16 %v1997_v14, %v2433_v54  ;;  %2179 = vmatpush3.bf16.msra.mxu1 %v2253_v63  ;;  %v408_v0 = vld [vmem:[%s393_s26] sm:$0xff] }
  0x52   : > { %v675_v29 = vrot.slane %v670_v15, %v2413_v28  ;;  %v580_v30 = vrot.slane %v1986_v16, %v2413_v28  ;;  %v2012_v31 = vcombine.low %v779_v19, %v780_v20  ;;  %v677_v33 = vpack.i.b16 %v576_v17, %v576_v17 }
  0x53   : > { %v1998_v32 = vcombine.low %v668_v24, %v668_v24  ;;  %v520_v34 = vpack.i.b16 %v504_v25, %v504_v25  ;;  %v2013_v35 = vcombine.low %v781_v26, %v782_v27  ;;  %v1974_v1 = vmul.f32 -1.442695, %v408_v0 }
  0x54   : > { %v1999_v36 = vcombine.low %v675_v29, %v675_v29  ;;  %v684_v37 = vpack.i.b16 %v580_v30, %v580_v30  ;;  %v682_v40 = vrot.slane %v677_v33, %v2413_v28 }
  0x55   : > { %v783_v38 = vmul.bf16 %v1998_v32, %v2428_v53  ;;  %v784_v39 = vmul.bf16 %v1998_v32, %v2433_v54  ;;  %v584_v41 = vrot.slane %v520_v34, %v2413_v28  ;;  %2273 = vpow2.f32 %v1974_v1 }
  0x56   : > { %2155 = vmatmul.mubr.bf16.gmra.mxu0 %v2008_v55  ;;  %v785_v42 = vmul.bf16 %v1999_v36, %v2428_v53  ;;  %v786_v43 = vmul.bf16 %v1999_v36, %v2433_v54  ;;  %v689_v44 = vrot.slane %v684_v37, %v2413_v28  ;;  %v2000_v46 = vcombine.low %v682_v40, %v682_v40 }
  0x57   : > { %2158 = vmatprep.mubr.bf16.mxu0 %v2009_v59  ;;  %v2014_v45 = vcombine.low %v783_v38, %v784_v39  ;;  %v691_v47 = vpack.i.b16 %v584_v41, %v584_v41 }
  0x58   : > { %v2015_v48 = vcombine.low %v785_v42, %v786_v43  ;;  %v2001_v49 = vcombine.low %v689_v44, %v689_v44  ;;  %v787_v50 = vmul.bf16 %v2000_v46, %v2428_v53  ;;  %v788_v51 = vmul.bf16 %v2000_v46, %v2433_v54 }
  0x59   : > { %v696_v52 = vrot.slane %v691_v47, %v2413_v28 }
  0x5a   : > { %v789_v55 = vmul.bf16 %v2001_v49, %v2428_v53  ;;  %v790_v56 = vmul.bf16 %v2001_v49, %v2433_v54  ;;  %v2016_v57 = vcombine.low %v787_v50, %v788_v51 }
  0x5b   : > { %v2002_v58 = vcombine.low %v696_v52, %v696_v52 }
  0x5c   : > { %v2017_v59 = vcombine.low %v789_v55, %v790_v56 }
  0x5d   : > { %v791_v60 = vmul.bf16 %v2002_v58, %v2428_v53  ;;  %v792_v61 = vmul.bf16 %v2002_v58, %v2433_v54  ;;  %v409_v54 = vld [vmem:[%s393_s26 + $0x8] sm:$0xff] }
  0x5e   : > { %2159 = vmatmul.mubr.bf16.gmra.mxu0 %v2010_v10  ;;  %v1975_v3 = vmul.f32 -1.442695, %v409_v54 }
  0x5f   : > { %2162 = vmatprep.mubr.bf16.mxu0 %v2011_v13  ;;  %v2018_v62 = vcombine.low %v791_v60, %v792_v61 }
  0x62   : > { %v2274_v2 = vpop.eup %2273 }
  0x63   : > { %v416_v53 = vadd.f32 1.0, %v2274_v2 }
  0x65   : > { %2275 = vrcp.f32 %v416_v53 }
  0x66   : > { %2163 = vmatmul.mubr.bf16.gmra.mxu0 %v2012_v31  ;;  %2277 = vpow2.f32 %v1975_v3 }
  0x67   : > { %2166 = vmatprep.mubr.bf16.mxu0 %v2013_v35 }
  0x6e   : > { %2167 = vmatmul.mubr.bf16.gmra.mxu0 %v2014_v45 }
  0x6f   : > { %2170 = vmatprep.mubr.bf16.mxu0 %v2015_v48 }
  0x72   : > { %v2502_v4 = vpop.eup %2275 }
  0x73   : > { %v1123_v5 = vrot.slane %v2502_v4, %v2405_v22  ;;  %v2278_v8 = vpop.eup %2277  ;;  %v1116_v16 = vcombine.high %v2502_v4, %v2502_v4 }
  0x74   : > { %v417_v12 = vadd.f32 1.0, %v2278_v8 }
  0x75   : > { %v1131_v6 = vcombine.high %v1123_v5, %v1123_v5  ;;  %v1139_v7 = vrot.slane %v1123_v5, %v2405_v22  ;;  %v1130_v30 = vrot.slane %v1116_v16, %v2405_v22 }
  0x76   : > { %2171 = vmatmul.mubr.bf16.gmra.mxu0 %v2016_v57  ;;  %2279 = vrcp.f32 %v417_v12 }
  0x77   : > { %2174 = vmatprep.mubr.bf16.mxu0 %v2017_v59  ;;  %v1153_v10 = vrot.slane %v1131_v6, %v2405_v22  ;;  %v1217_v13 = vrot.slane %v1139_v7, %v2413_v28  ;;  %v1161_v25 = vcombine.high %v1139_v7, %v1139_v7  ;;  %v1132_v37 = vcombine.high %v1130_v30, %v1130_v30 }
  0x78   : > { %v1146_v42 = vrot.slane %v1130_v30, %v2405_v22 }
  0x79   : > { %v1221_v14 = vrot.slane %v1153_v10, %v2413_v28  ;;  %v1163_v29 = vcombine.high %v1153_v10, %v1153_v10  ;;  %v1225_v34 = vrot.slane %v1161_v25, %v2413_v28  ;;  %v1160_v45 = vrot.slane %v1132_v37, %v2405_v22 }
  0x7a   : > { %v1233_v49 = vrot.slane %v1146_v42, %v2413_v28  ;;  %v1162_v59 = vcombine.high %v1146_v42, %v1146_v42 }
  0x7b   : > { %v1229_v35 = vrot.slane %v1163_v29, %v2413_v28  ;;  %v1237_v51 = vrot.slane %v1160_v45, %v2413_v28 }
  0x7c   : > { %v1241_v53 = vrot.slane %v1162_v59, %v2413_v28 }
  0x7e   : > { %2175 = vmatmul.mubr.bf16.gmra.mxu0 %v2018_v62  ;;  %v1164_v62 = vcombine.high %v1160_v45, %v1160_v45 }
  0x80   : > { %v1245_v54 = vrot.slane %v1164_v62, %v2413_v28 }
  0x83   : > { %v2521_v50 = vpop.eup %2279 }
  0x84   : > { %v1172_v63 = vrot.slane %v2521_v50, %v2405_v22 }
  0x86   : > { %v1180_v5 = vcombine.high %v1172_v63, %v1172_v63  ;;  %v1188_v10 = vrot.slane %v1172_v63, %v2405_v22 }
  0x88   : > { %v1210_v30 = vcombine.high %v1188_v10, %v1188_v10 }
 0x106   : > { %v2148_v9 = vpop.f32.mrf.mxu0 }
 0x107   : > { %v1296_v26 = vmul.f32 %v2148_v9, %v1221_v14 }
 0x108   : > { %v987_v11 = vpop.f32.mrf.mxu0 }
 0x109   : > { %v1294_v20 = vmul.f32 %v1217_v13, %v987_v11 }
 0x10a   : > { %v2149_v15 = vpop.f32.mrf.mxu0 }
 0x10b   : > { %v1297_v17 = vmul.f32 %v2149_v15, %v1221_v14 }
 0x10c   : > { %v990_v19 = vpop.f32.mrf.mxu0 }
 0x10d   : > { %v1295_v24 = vmul.f32 %v1217_v13, %v990_v19  ;;  %v1327_v32 = vpack.c.bf16 %v1297_v17, %v1296_v26  ;;  %v1202_v13 = vrot.slane %v1180_v5, %v2405_v22  ;;  %v1249_v17 = vrot.slane %v1188_v10, %v2413_v28 }
 0x10e   : > { %v2152_v27 = vpop.f32.mrf.mxu0 }
 0x10f   : > { %v1326_v31 = vpack.c.bf16 %v1295_v24, %v1294_v20  ;;  %v1300_v43 = vmul.f32 %v2152_v27, %v1229_v35  ;;  %v1253_v19 = vrot.slane %v1202_v13, %v2413_v28  ;;  %v1165_v24 = vcombine.high %v2521_v50, %v2521_v50 }
 0x110   : > { %v1003_v33 = vpop.f32.mrf.mxu0 }
 0x111   : > { %2180 = vmatprep.mubr.msk.bf16.mxu1 %vm1357_vm0, %v1326_v31  ;;  %v1298_v40 = vmul.f32 %v1225_v34, %v1003_v33  ;;  %v1212_v33 = vcombine.high %v1202_v13, %v1202_v13 }
 0x112   : > { %v2153_v36 = vpop.f32.mrf.mxu0  ;;  %2181 = vmatmul.mubr.msk.bf16.vlgmr.msra.gmra.mxu1 %vm1357_vm0, %v1327_v32 }
 0x113   : > { %v1301_v38 = vmul.f32 %v2153_v36, %v1229_v35 }
 0x114   : > { %v1006_v39 = vpop.f32.mrf.mxu0 }
 0x115   : > { %v1299_v41 = vmul.f32 %v1225_v34, %v1006_v39  ;;  %v1329_v47 = vpack.c.bf16 %v1301_v38, %v1300_v43  ;;  %v1179_v34 = vrot.slane %v1165_v24, %v2405_v22  ;;  %v1257_v38 = vrot.slane %v1210_v30, %v2413_v28 }
 0x116   : > { %v2156_v44 = vpop.f32.mrf.mxu0  ;;  %v1261_v39 = vrot.slane %v1212_v33, %v2413_v28 }
 0x117   : > { %v1328_v46 = vpack.c.bf16 %v1299_v41, %v1298_v40  ;;  %v1304_v60 = vmul.f32 %v2156_v44, %v1237_v51  ;;  %v1181_v41 = vcombine.high %v1179_v34, %v1179_v34 }
 0x118   : > { %v1019_v48 = vpop.f32.mrf.mxu0 }
 0x119   : > { %2184 = vmatprep.mubr.msk.bf16.mxu1 %vm1357_vm0, %v1328_v46  ;;  %v1302_v57 = vmul.f32 %v1233_v49, %v1019_v48  ;;  %v1195_v46 = vrot.slane %v1179_v34, %v2405_v22 }
 0x11a   : > { %v2157_v52 = vpop.f32.mrf.mxu0  ;;  %2185 = vmatmul.mubr.msk.bf16.gmra.mxu1 %vm1357_vm0, %v1329_v47 }
 0x11b   : > { %v1305_v55 = vmul.f32 %v2157_v52, %v1237_v51  ;;  %v1211_v63 = vcombine.high %v1195_v46, %v1195_v46 }
 0x11c   : > { %v1022_v56 = vpop.f32.mrf.mxu0 }
 0x11d   : > { %v1303_v58 = vmul.f32 %v1233_v49, %v1022_v56  ;;  %v1331_v1 = vpack.c.bf16 %v1305_v55, %v1304_v60  ;;  %v1209_v49 = vrot.slane %v1181_v41, %v2405_v22  ;;  %v1265_v56 = vrot.slane %v1195_v46, %v2413_v28 }
 0x11e   : > { %v2160_v61 = vpop.f32.mrf.mxu0 }
 0x11f   : > { %v1330_v0 = vpack.c.bf16 %v1303_v58, %v1302_v57  ;;  %v1308_v11 = vmul.f32 %v2160_v61, %v1245_v54  ;;  %v1269_v57 = vrot.slane %v1209_v49, %v2413_v28  ;;  %v1213_v22 = vcombine.high %v1209_v49, %v1209_v49 }
 0x120   : > { %v1035_v2 = vpop.f32.mrf.mxu0 }
 0x121   : > { %2188 = vmatprep.mubr.msk.bf16.mxu1 %vm1357_vm0, %v1330_v0  ;;  %v1306_v8 = vmul.f32 %v1241_v53, %v1035_v2  ;;  %v1277_v5 = vrot.slane %v1213_v22, %v2413_v28 }
 0x122   : > { %v2161_v3 = vpop.f32.mrf.mxu0  ;;  %2189 = vmatmul.mubr.msk.bf16.gmra.mxu1 %vm1357_vm0, %v1331_v1 }
 0x123   : > { %v1309_v6 = vmul.f32 %v2161_v3, %v1245_v54  ;;  %v1273_v3 = vrot.slane %v1211_v63, %v2413_v28  ;;  %v2257_v28 = vld [vmem:[%s2696_s5 + $0x38] sm:$0xff]  }
 0x124   : > { %v1038_v7 = vpop.f32.mrf.mxu0 }
 0x125   : > { %v1307_v9 = vmul.f32 %v1241_v53, %v1038_v7  ;;  %v1333_v15 = vpack.c.bf16 %v1309_v6, %v1308_v11 }
 0x126   : > { %v2164_v12 = vpop.f32.mrf.mxu0 }
 0x127   : > { %v1332_v14 = vpack.c.bf16 %v1307_v9, %v1306_v8  ;;  %v1312_v31 = vmul.f32 %v2164_v12, %v1253_v19 }
 0x128   : > { %v1051_v16 = vpop.f32.mrf.mxu0 }
 0x129   : > { %2192 = vmatprep.mubr.msk.bf16.mxu1 %vm1357_vm0, %v1332_v14  ;;  %v1310_v27 = vmul.f32 %v1249_v17, %v1051_v16  ;;  %v2256_v14 = vld [vmem:[%s2695_s4 + $0x4] ss:$8 sps:$4 sm:$0xff]   ;;  %v2258_v16 = vld [vmem:[%s2696_s5 + $0x30] sm:$0xff]  }
 0x12a   : > { %v2165_v20 = vpop.f32.mrf.mxu0  ;;  %2193 = vmatmul.mubr.msk.bf16.gmra.mxu1 %vm1357_vm0, %v1333_v15  ;;  %v2306_v15 = vmov 0.0  }
 0x12b   : > { %v1313_v25 = vmul.f32 %v2165_v20, %v1253_v19  ;;  %2212 = vmatprep.subr.bf16.mxu0 %v2306_v15  ;;  %v2260_v19 = vld [vmem:[%s2696_s5 + $0x20] sm:$0xff]   ;;  %v2261_v20 = vld [vmem:[%s2696_s5 + $0x18] sm:$0xff]   ;;  %2228 = vmatprep.mubr.msk.bf16.mxu0 %vm2307_vm1, %v2306_v15 }
 0x12c   : > { %v1054_v26 = vpop.f32.mrf.mxu0  ;;  %2213 = vmatpush3.bf16.msra.mxu0 %v2257_v28 }
 0x12d   : > { %v1311_v29 = vmul.f32 %v1249_v17, %v1054_v26  ;;  %v1335_v36 = vpack.c.bf16 %v1313_v25, %v1312_v31  ;;  %2214 = vmatprep.subr.bf16.mxu0 %v2306_v15  ;;  %v2259_v17 = vld [vmem:[%s2696_s5 + $0x28] sm:$0xff]   ;;  %v2583_v25 = vld [vmem:[%s2694_s3] ss:$0 sm:$0xff] }
 0x12e   : > { %v2168_v32 = vpop.f32.mrf.mxu0 }
 0x12f   : > { %v1334_v35 = vpack.c.bf16 %v1311_v29, %v1310_v27  ;;  %v1316_v47 = vmul.f32 %v2168_v32, %v1261_v39 }
 0x130   : > { %v1067_v37 = vpop.f32.mrf.mxu0  ;;  %2215 = vmatpush3.bf16.msra.mxu0 %v2258_v16 }
 0x131   : > { %2196 = vmatprep.mubr.msk.bf16.mxu1 %vm1357_vm0, %v1334_v35  ;;  %v1314_v44 = vmul.f32 %v1257_v38, %v1067_v37  ;;  %2216 = vmatprep.subr.bf16.mxu0 %v2306_v15 }
 0x132   : > { %v2169_v40 = vpop.f32.mrf.mxu0  ;;  %2197 = vmatmul.mubr.msk.bf16.gmra.mxu1 %vm1357_vm0, %v1335_v36 }
 0x133   : > { %v1317_v42 = vmul.f32 %v2169_v40, %v1261_v39 }
 0x134   : > { %v1070_v43 = vpop.f32.mrf.mxu0  ;;  %2217 = vmatpush3.bf16.msra.mxu0 %v2259_v17 }
 0x135   : > { %v1315_v45 = vmul.f32 %v1257_v38, %v1070_v43  ;;  %v1337_v52 = vpack.c.bf16 %v1317_v42, %v1316_v47  ;;  %2218 = vmatprep.subr.bf16.mxu0 %v2306_v15 }
 0x136   : > { %v2172_v48 = vpop.f32.mrf.mxu0 }
 0x137   : > { %v1336_v51 = vpack.c.bf16 %v1315_v45, %v1314_v44  ;;  %v1320_v0 = vmul.f32 %v2172_v48, %v1269_v57 }
 0x138   : > { %v1083_v55 = vpop.f32.mrf.mxu0  ;;  %2219 = vmatpush3.bf16.msra.mxu0 %v2260_v19 }
 0x139   : > { %2200 = vmatprep.mubr.msk.bf16.mxu1 %vm1357_vm0, %v1336_v51  ;;  %v1318_v61 = vmul.f32 %v1265_v56, %v1083_v55  ;;  %2220 = vmatprep.subr.bf16.mxu0 %v2306_v15 }
 0x13a   : > { %v2173_v58 = vpop.f32.mrf.mxu0  ;;  %2201 = vmatmul.mubr.msk.bf16.gmra.mxu1 %vm1357_vm0, %v1337_v52 }
 0x13b   : > { %v1321_v59 = vmul.f32 %v2173_v58, %v1269_v57 }
 0x13c   : > { %v1086_v60 = vpop.f32.mrf.mxu0  ;;  %2221 = vmatpush3.bf16.msra.mxu0 %v2261_v20 }
 0x13d   : > { %v1319_v62 = vmul.f32 %v1265_v56, %v1086_v60  ;;  %v1339_v53 = vpack.c.bf16 %v1321_v59, %v1320_v0  ;;  %2222 = vmatprep.subr.bf16.mxu0 %v2306_v15 }
 0x13e   : > { %v2176_v1 = vpop.f32.mrf.mxu0 }
 0x13f   : > { %v1338_v2 = vpack.c.bf16 %v1319_v62, %v1318_v61  ;;  %v1324_v11 = vmul.f32 %v2176_v1, %v1277_v5 }
 0x140   : > { %v1099_v54 = vpop.f32.mrf.mxu0 }
 0x141   : > { %2204 = vmatprep.mubr.msk.bf16.mxu1 %vm1357_vm0, %v1338_v2  ;;  %v1322_v9 = vmul.f32 %v1273_v3, %v1099_v54 }
 0x142   : > { %v2177_v6 = vpop.f32.mrf.mxu0  ;;  %2205 = vmatmul.mubr.msk.bf16.gmra.mxu1 %vm1357_vm0, %v1339_v53 }
 0x143   : > { %v1325_v7 = vmul.f32 %v2177_v6, %v1277_v5 }
 0x144   : > { %v1102_v8 = vpop.f32.mrf.mxu0 }
 0x145   : > { %v1323_v10 = vmul.f32 %v1273_v3, %v1102_v8  ;;  %v1341_v13 = vpack.c.bf16 %v1325_v7, %v1324_v11 }
 0x147   : > { %v1340_v12 = vpack.c.bf16 %v1323_v10, %v1322_v9 }
 0x149   : > { %2208 = vmatprep.mubr.msk.bf16.mxu1 %vm1357_vm0, %v1340_v12 }
 0x14a   : > { %2209 = vmatmul.mubr.msk.bf16.gmra.mxu1 %vm1357_vm0, %v1341_v13 }
 0x14b   : > { %1659 = vmatprep.mubr.bf16.mxu1 %v2256_v14 }
 0x1d2   : > { %v2182_v24 = vpop.f32.mrf.mxu1 }
 0x1d3   : > { %v1449_v27 = vadd.f32 %v2182_v24, %v2583_v25 }
 0x1d4   : > { %v1440_v26 = vpop.f32.mrf.mxu1 }
 0x1d5   : > { %v1441_v30 = vadd.f32 %v2583_v25, %v1440_v26  ;;  %v1569_v33 = vmax.f32 %v1449_v27, 0.0 }
 0x1d6   : > { %v2183_v29 = vpop.f32.mrf.mxu1 }
 0x1d7   : > { %v1452_v31 = vadd.f32 %v2183_v29, %v2583_v25  ;;  %v1567_v37 = vmax.f32 %v1441_v30, 0.0 }
 0x1d8   : > { %v1443_v32 = vpop.f32.mrf.mxu1 }
 0x1d9   : > { %v1570_v34 = vmax.f32 %v1452_v31, 0.0  ;;  %v1444_v35 = vadd.f32 %v2583_v25, %v1443_v32 }
 0x1da   : > { %v2186_v36 = vpop.f32.mrf.mxu1 }
 0x1db   : > { %v2589_v38 = vpack.c.bf16 %v1570_v34, %v1569_v33  ;;  %v1568_v39 = vmax.f32 %v1444_v35, 0.0  ;;  %v1465_v42 = vadd.f32 %v2186_v36, %v2583_v25 }
 0x1dc   : > { %v1456_v40 = vpop.f32.mrf.mxu1 }
 0x1dd   : > { %v2591_v41 = vpack.c.bf16 %v1568_v39, %v1567_v37  ;;  %v1457_v44 = vadd.f32 %v2583_v25, %v1456_v40  ;;  %v1573_v47 = vmax.f32 %v1465_v42, 0.0 }
 0x1de   : > { %v2187_v43 = vpop.f32.mrf.mxu1 }
 0x1df   : > { %v1468_v45 = vadd.f32 %v2187_v43, %v2583_v25  ;;  %v1571_v52 = vmax.f32 %v1457_v44, 0.0 }
 0x1e0   : > { %v1459_v46 = vpop.f32.mrf.mxu1 }
 0x1e1   : > { %v1574_v48 = vmax.f32 %v1468_v45, 0.0  ;;  %v1460_v49 = vadd.f32 %v2583_v25, %v1459_v46 }
 0x1e2   : > { %v2190_v51 = vpop.f32.mrf.mxu1 }
 0x1e3   : > { %v2597_v55 = vpack.c.bf16 %v1574_v48, %v1573_v47  ;;  %v1572_v56 = vmax.f32 %v1460_v49, 0.0  ;;  %v1481_v46 = vadd.f32 %v2190_v51, %v2583_v25 }
 0x1e4   : > { %v1472_v57 = vpop.f32.mrf.mxu1 }
 0x1e5   : > { %v2599_v58 = vpack.c.bf16 %v1572_v56, %v1571_v52 }
 0x1e6   : > { %v2191_v59 = vpop.f32.mrf.mxu1 }
 0x1e7   : > { %v1484_v39 = vadd.f32 %v2191_v59, %v2583_v25 }
 0x1e8   : > { %v1475_v60 = vpop.f32.mrf.mxu1 }
 0x1e9   : > { %v1578_v52 = vmax.f32 %v1484_v39, 0.0  ;;  %v1476_v56 = vadd.f32 %v2583_v25, %v1475_v60 }
 0x1ea   : > { %v2194_v61 = vpop.f32.mrf.mxu1 }
 0x1eb   : > { %v1497_v28 = vadd.f32 %v2194_v61, %v2583_v25 }
 0x1ec   : > { %v1488_v62 = vpop.f32.mrf.mxu1 }
 0x1ed   : > { %v1581_v32 = vmax.f32 %v1497_v28, 0.0  ;;  %v1489_v33 = vadd.f32 %v2583_v25, %v1488_v62 }
 0x1ee   : > { %v2195_v63 = vpop.f32.mrf.mxu1 }
 0x1ef   : > { %v1500_v12 = vadd.f32 %v2195_v63, %v2583_v25  ;;  %v1579_v47 = vmax.f32 %v1489_v33, 0.0 }
 0x1f0   : > { %v1491_v0 = vpop.f32.mrf.mxu1 }
 0x1f1   : > { %v1582_v20 = vmax.f32 %v1500_v12, 0.0  ;;  %v1492_v24 = vadd.f32 %v2583_v25, %v1491_v0  ;;  %v1577_v0 = vmax.f32 %v1481_v46, 0.0 }
 0x1f2   : > { %v2601_v1 = vpop.f32.mrf.mxu1 }
 0x1f3   : > { %v1608_v40 = vpack.c.bf16 %v1582_v20, %v1581_v32  ;;  %v1580_v42 = vmax.f32 %v1492_v24, 0.0 }
 0x1f4   : > { %v2603_v22 = vpop.f32.mrf.mxu1 }
 0x1f5   : > { %v1607_v61 = vpack.c.bf16 %v1580_v42, %v1579_v47 }
 0x1f6   : > { %v2605_v2 = vpop.f32.mrf.mxu1 }
 0x1f8   : > { %v2607_v53 = vpop.f32.mrf.mxu1 }
 0x1f9   : > { %v1508_v20 = vadd.f32 %v2583_v25, %v2607_v53  ;;  %v1784_v53 = vld [vmem:[%s387_s14 + $0x8] sm:$0xff] }
 0x1fa   : > { %v2202_v54 = vpop.f32.mrf.mxu1 }
 0x1fb   : > { %v1529_v51 = vadd.f32 %v2202_v54, %v2583_v25 }
 0x1fc   : > { %v1520_v3 = vpop.f32.mrf.mxu1 }
 0x1fe   : > { %v2203_v5 = vpop.f32.mrf.mxu1 }
 0x1ff   : > { %v1532_v59 = vadd.f32 %v2203_v5, %v2583_v25  ;;  %v1521_v5 = vadd.f32 %v2583_v25, %v1520_v3 }
 0x200   : > { %v1523_v6 = vpop.f32.mrf.mxu1 }
 0x201   : > { %v1524_v12 = vadd.f32 %v2583_v25, %v1523_v6 }
 0x202   : > { %v2206_v7 = vpop.f32.mrf.mxu1 }
 0x203   : > { %v1545_v34 = vadd.f32 %v2206_v7, %v2583_v25  ;;  %v1473_v7 = vadd.f32 %v2583_v25, %v1472_v57  ;;  %v1516_v57 = vadd.f32 %v2605_v2, %v2583_v25  ;;  %v1588_v54 = vmax.f32 %v1524_v12, 0.0 }
 0x204   : > { %v1536_v8 = vpop.f32.mrf.mxu1  ;;  %v1805_v12 = vsub.f32 0.0, %v2521_v50 }
 0x205   : > { %v1593_v48 = vmax.f32 %v1545_v34, 0.0  ;;  %v1537_v49 = vadd.f32 %v2583_v25, %v1536_v8  ;;  %v1590_v8 = vmax.f32 %v1532_v59, 0.0  ;;  %v1575_v60 = vmax.f32 %v1473_v7, 0.0 }
 0x206   : > { %v2207_v9 = vpop.f32.mrf.mxu1  ;;  %v1586_v6 = vmax.f32 %v1516_v57, 0.0  ;;  %v1815_v59 = vsub.f32 1.0, %v2521_v50  ;;  %v1828_v7 = vadd.f32 1e-15, %v2403_v21 }
 0x207   : > { %v1548_v27 = vadd.f32 %v2207_v9, %v2583_v25  ;;  %v1591_v9 = vmax.f32 %v1537_v49, 0.0  ;;  %v1848_v49 = vmul.f32 0.1, %v2502_v4 }
 0x208   : > { %v1539_v10 = vpop.f32.mrf.mxu1 }
 0x209   : > { %v1594_v43 = vmax.f32 %v1548_v27, 0.0  ;;  %v1540_v44 = vadd.f32 %v2583_v25, %v1539_v10  ;;  %v1606_v10 = vpack.c.bf16 %v1578_v52, %v1577_v0  ;;  %v1584_v27 = vmax.f32 %v1508_v20, 0.0 }
 0x20a   : > { %v2210_v11 = vpop.f32.mrf.mxu1  ;;  %v1836_v0 = vsub.f32 1.0, %v2403_v21 }
 0x20b   : > { %v1561_v14 = vadd.f32 %v2210_v11, %v2583_v25  ;;  %v1614_v62 = vpack.c.bf16 %v1594_v43, %v1593_v48  ;;  %v1592_v63 = vmax.f32 %v1540_v44, 0.0  ;;  %v1576_v11 = vmax.f32 %v1476_v56, 0.0 }
 0x20c   : > { %v1552_v13 = vpop.f32.mrf.mxu1  ;;  %v1804_v43 = vsub.f32 0.0, %v2502_v4 }
 0x20d   : > { %v1553_v17 = vadd.f32 %v2583_v25, %v1552_v13  ;;  %v1597_v29 = vmax.f32 %v1561_v14, 0.0  ;;  %v1613_v13 = vpack.c.bf16 %v1592_v63, %v1591_v9  ;;  %v1589_v14 = vmax.f32 %v1529_v51, 0.0 }
 0x20e   : > { %v2211_v16 = vpop.f32.mrf.mxu1  ;;  %v1605_v28 = vpack.c.bf16 %v1576_v11, %v1575_v60  ;;  %v1817_v63 = vadd.f32 1e-15, %v1815_v59  ;;  %v1838_v51 = vadd.f32 1e-15, %v1836_v0  ;;  %v1837_v9 = vsub.f32 1.0, %v2407_v23 }
 0x20f   : > { %v1564_v19 = vadd.f32 %v2211_v16, %v2583_v25  ;;  %v1595_v35 = vmax.f32 %v1553_v17, 0.0  ;;  %v1612_v16 = vpack.c.bf16 %v1590_v8, %v1589_v14  ;;  %v1513_v17 = vadd.f32 %v2601_v1, %v2583_v25 }
 0x210   : > { %v1555_v26 = vpop.f32.mrf.mxu1 }
 0x211   : > { %v1598_v30 = vmax.f32 %v1564_v19, 0.0  ;;  %v1556_v31 = vadd.f32 %v2583_v25, %v1555_v26  ;;  %v1587_v19 = vmax.f32 %v1521_v5, 0.0  ;;  %v1585_v3 = vmax.f32 %v1513_v17, 0.0 }
 0x212   : > { %v1505_v26 = vadd.f32 %v2583_v25, %v2603_v22  ;;  %v2262_v25 = vld [vmem:[%s2696_s5 + $0x10] sm:$0xff]   ;;  %v1783_v22 = vld [vmem:[%s387_s14] sm:$0xff]  ;;  %v1826_v17 = vsub.f32 0.0, %v2403_v21 }
 0x213   : > { %v1616_v36 = vpack.c.bf16 %v1598_v30, %v1597_v29  ;;  %v1596_v37 = vmax.f32 %v1556_v31, 0.0  ;;  %v1611_v24 = vpack.c.bf16 %v1588_v54, %v1587_v19  ;;  %v1610_v2 = vpack.c.bf16 %v1586_v6, %v1585_v3  ;;  %2223 = vmatpush3.bf16.msra.mxu0 %v2262_v25 }
 0x214   : > { %v1583_v29 = vmax.f32 %v1505_v26, 0.0  ;;  %2224 = vmatprep.subr.bf16.mxu0 %v2306_v15  ;;  %v1782_v54 = vand.u32 127, %v444_v18  ;;  %v2047_v26 = vld [vmem:[%s2697_s6] ss:$0 sm:$0xff]  ;;  %v1827_v25 = vsub.f32 0.0, %v2407_v23 }
 0x215   : > { %v1615_v45 = vpack.c.bf16 %v1596_v37, %v1595_v35  ;;  %2099 = vmatprep.subr.bf16.mxu1 %v1616_v36  ;;  %v1806_v37 = vadd.f32 1e-15, %v2502_v4 }
 0x216   : > { %2100 = vmatpush3.bf16.msra.mxu1 %v1608_v40  ;;  %v1609_v1 = vpack.c.bf16 %v1584_v27, %v1583_v29 }
 0x217   : > { %2101 = vmatprep.subr.bf16.mxu1 %v1615_v45  ;;  %2281 = vlog2.f32 %v1806_v37 }
 0x21a   : > { %2102 = vmatpush3.bf16.msra.mxu1 %v1607_v61 }
 0x21b   : > { %2103 = vmatprep.subr.bf16.mxu1 %v1614_v62  ;;  %v1807_v62 = vadd.f32 1e-15, %v2521_v50 }
 0x21e   : > { %2104 = vmatpush3.bf16.msra.mxu1 %v1606_v10  ;;  %v1839_v10 = vadd.f32 1e-15, %v1837_v9 }
 0x21f   : > { %2105 = vmatprep.subr.bf16.mxu1 %v1613_v13 }
 0x222   : > { %2106 = vmatpush3.bf16.msra.mxu1 %v1605_v28 }
 0x223   : > { %2107 = vmatprep.subr.bf16.mxu1 %v1612_v16 }
 0x224   : > { %v2282_v40 = vpop.eup %2281 }
 0x225   : > { %v1809_v44 = vmul.f32 0.6931472, %v2282_v40 }
 0x226   : > { %2108 = vmatpush3.bf16.msra.mxu1 %v2597_v55  ;;  %v2254_v55 = vld [vmem:[%s2695_s4] ss:$8 sps:$4 sm:$0xff]  }
 0x227   : > { %2109 = vmatprep.subr.bf16.mxu1 %v1611_v24  ;;  %v1812_v46 = vmul.f32 %v1809_v44, %v1804_v43  ;;  %v1864_v44 = vmul.f32 0.5, %v2407_v23 }
 0x22a   : > { %2110 = vmatpush3.bf16.msra.mxu1 %v2599_v58  ;;  %v2263_v58 = vld [vmem:[%s2696_s5 + $0x8] sm:$0xff]  }
 0x22b   : > { %2111 = vmatprep.subr.bf16.mxu1 %v1610_v2  ;;  %2225 = vmatpush3.bf16.msra.mxu0 %v2263_v58  ;;  %v1849_v2 = vmul.f32 0.1, %v2521_v50  ;;  %v1863_v50 = vmul.f32 0.5, %v2403_v21 }
 0x22c   : > { %2226 = vmatprep.subr.bf16.mxu0 %v2306_v15  ;;  %v1814_v15 = vsub.f32 1.0, %v2502_v4  ;;  %v1829_v4 = vadd.f32 1e-15, %v2407_v23 }
 0x22e   : > { %2112 = vmatpush3.bf16.msra.mxu1 %v2589_v38  ;;  %v2264_v38 = vld [vmem:[%s2696_s5] sm:$0xff]   ;;  %v1816_v39 = vadd.f32 1e-15, %v1814_v15 }
 0x22f   : > { %2113 = vmatprep.subr.bf16.mxu1 %v1609_v1  ;;  %2227 = vmatpush3.bf16.msra.mxu0 %v2264_v38 }
 0x230   : > { %2283 = vlog2.f32 %v1816_v39 }
 0x231   : > { %2285 = vlog2.f32 %v1807_v62 }
 0x232   : > { %2114 = vmatpush3.bf16.msra.mxu1 %v2591_v41  ;;  %v2308_v41 = vmov 0   ;;  %2287 = vlog2.f32 %v1817_v63 }
 0x233   : > { %2244 = vset.pattern.permute.xlu0 %v2308_v41  ;;  %2289 = vlog2.f32 %v1828_v7 }
 0x234   : > { %1786 = vperm.xlu0 %2244, %v1783_v22   ;;  %2291 = vlog2.f32 %v1838_v51 }
 0x235   : > { %1660 = vmatmul.mubr.bf16.vlgmr.msra.gmra.mxu1 %v2254_v55  ;;  %2293 = vlog2.f32 %v1829_v4 }
 0x236   : > { %2295 = vlog2.f32 %v1839_v10 }
 0x238   : > { %1789 = vperm.xlu0 %2244, %v1784_v53  }
 0x23d   : > { %v2284_v42 = vpop.eup %2283 }
 0x23e   : > { %v1819_v45 = vmul.f32 0.6931472, %v2284_v42  ;;  %v2286_v11 = vpop.eup %2285 }
 0x23f   : > { %v2288_v8 = vpop.eup %2287  ;;  %v1811_v13 = vmul.f32 0.6931472, %v2286_v11 }
 0x240   : > { %v1822_v47 = vmul.f32 %v1819_v45, %v1814_v15  ;;  %v1821_v60 = vmul.f32 0.6931472, %v2288_v8  ;;  %v2290_v28 = vpop.eup %2289 }
 0x241   : > { %v1813_v14 = vmul.f32 %v1811_v13, %v1805_v12  ;;  %v2292_v57 = vpop.eup %2291  ;;  %v1831_v19 = vmul.f32 0.6931472, %v2290_v28 }
 0x242   : > { %v1824_v48 = vsub.f32 %v1812_v46, %v1822_v47  ;;  %v1823_v5 = vmul.f32 %v1821_v60, %v1815_v59  ;;  %v1841_v6 = vmul.f32 0.6931472, %v2292_v57  ;;  %v2294_v20 = vpop.eup %2293 }
 0x243   : > { %v2296_v3 = vpop.eup %2295  ;;  %v1834_v1 = vmul.f32 %v1831_v19, %v1826_v17  ;;  %v1833_v58 = vmul.f32 0.6931472, %v2294_v20 }
 0x244   : > { %v1850_v52 = vmul.f32 0.1, %v1824_v48  ;;  %v1825_v16 = vsub.f32 %v1813_v14, %v1823_v5  ;;  %v1844_v55 = vmul.f32 %v1841_v6, %v1836_v0  ;;  %v1843_v38 = vmul.f32 0.6931472, %v2296_v3 }
 0x246   : > { %v1852_v56 = vadd.f32 %v1850_v52, %v1848_v49  ;;  %v1851_v27 = vmul.f32 0.1, %v1825_v16 }
 0x248   : > { %v1854_v61 = vsel %vm1357_vm0, %v1852_v56, 0.0  ;;  %v1853_v22 = vadd.f32 %v1851_v27, %v1849_v2 }
 0x249   : > { %1855 = vadd.xlane.f32.xlu1 %v1854_v61 }
 0x24a   : > { %v1857_v15 = vsel %vm1357_vm0, %v1853_v22, 0.0 }
 0x2af   : > { %v1787_v24 = vpop.permute.xlu0 %1786 }
 0x2b0   : > { %vm1791_vm2 = vcmp.eq.s32.totalorder %v1782_v54, %v1787_v24 }
 0x2d2   : > { %v1856_v45 = vpop.xlane.xlu1 %1855 }
 0x2d3   : > { %v1861_v52 = vmul.f32 0.0625, %v1856_v45 }
 0x2f5   : > { %v2115_v30 = vpop.f32.mrf.mxu1 }
 0x2f7   : > { %v2116_v31 = vpop.f32.mrf.mxu1 }
 0x2f8   : > { %v2117_v34 = vadd.f32 %v2116_v31, %v2115_v30  ;;  %v1790_v30 = vpop.permute.xlu0 %1789 }
 0x2f9   : > { %v2118_v32 = vpop.f32.mrf.mxu1  ;;  %vm1792_vm4 = vcmp.eq.s32.totalorder %v1782_v54, %v1790_v30 }
 0x2fb   : > { %v2119_v33 = vpop.f32.mrf.mxu1 }
 0x2fc   : > { %v2120_v35 = vadd.f32 %v2119_v33, %v2118_v32 }
 0x2fe   : > { %v1668_v36 = vpack.c.bf16 %v2120_v35, %v2117_v34  ;;  %v1846_v34 = vsub.f32 %v1834_v1, %v1844_v55  ;;  %v1835_v35 = vmul.f32 %v1833_v58, %v1827_v25 }
 0x300   : > { %2229 = vmatmul.mubr.bf16.vlgmr.msra.gmra.mxu0 %v1668_v36  ;;  %v1845_v36 = vmul.f32 %v1843_v38, %v1837_v9  ;;  %v1865_v42 = vadd.f32 %v1863_v50, %v1846_v34 }
 0x302   : > { %v1847_v43 = vsub.f32 %v1835_v35, %v1845_v36 }
 0x304   : > { %v1866_v21 = vadd.f32 %v1864_v44, %v1847_v43 }
 0x3c0   : > { %v1774_v29 = vpop.f32.mrf.mxu0 }
 0x3c1   : > { %v1775_v18 = vadd.f32 %v2047_v26, %v1774_v29 }
 0x3c2   : > { %v2230_v41 = vpop.f32.mrf.mxu0 }
 0x3c3   : > { %v1793_v53 = vsel %vm1791_vm2, %v1775_v18, 0.0 }
 0x3c4   : > { %v1796_v31 = vsel %vm1795_vm3, %v1793_v53, 0.0  ;;  %v1777_v32 = vpop.f32.mrf.mxu0 }
 0x3c5   : > { %1797 = vadd.xlane.f32.xlu1 %v1796_v31  ;;  %v1778_v33 = vadd.f32 %v2047_v26, %v1777_v32 }
 0x3c6   : > { %v2231_v37 = vpop.f32.mrf.mxu0 }
 0x3c7   : > { %v1794_v39 = vsel %vm1792_vm4, %v1778_v33, 0.0 }
 0x3c8   : > { %v1799_v40 = vsel %vm1795_vm3, %v1794_v39, 0.0 }
 0x3c9   : > { %1858 = vadd.xlane.f32.xlu1 %v1857_v15  ;;  %1800 = vadd.xlane.f32.xlu0 %v1799_v40 }
 0x3cd   : > { %1867 = vadd.xlane.f32.xlu1 %v1865_v42 }
 0x3d1   : > { %1869 = vadd.xlane.f32.xlu1 %v1866_v21 }
 0x44e   : > { %v1798_v46 = vpop.xlane.xlu1 %1797 }
 0x44f   : > { %v1802_v48 = vsub.f32 0.0, %v1798_v46 }
 0x451   : > { %v1874_v61 = vadd.f32 %v1861_v52, %v1802_v48 }
 0x452   : > { %v1859_v47 = vpop.xlane.xlu1 %1858  ;;  %v1801_v49 = vpop.xlane.xlu0 %1800 }
 0x453   : > { %v1862_v59 = vmul.f32 0.0625, %v1859_v47  ;;  %v1803_v63 = vsub.f32 0.0, %v1801_v49 }
 0x455   : > { %v1875_v7 = vadd.f32 %v1862_v59, %v1803_v63 }
 0x456   : > { %v1868_v56 = vpop.xlane.xlu1 %1867 }
 0x457   : > { %v1872_v62 = vmul.f32 0.0078125, %v1868_v56 }
 0x459   : > { %v1876_v23 = vadd.f32 %v1874_v61, %v1872_v62 }
 0x45a   : > { %v1870_v0 = vpop.xlane.xlu1 %1869 }
 0x45b   : > { %1879 = vst.msk [vmem:[%s405_s19] sm:$0xff] %vm1878_vm5, %v1876_v23  ;;  %v1873_v51 = vmul.f32 0.0078125, %v1870_v0 }
 0x45d   : > { %v1877_v9 = vadd.f32 %v1875_v7, %v1873_v51 }
 0x45f   : > { %1880 = vst.msk [vmem:[%s405_s19 + $0x8] sm:$0xff] %vm1878_vm5, %v1877_v9 }
 0x460 PF: > { %s20_s13 = sadd.s32 1, %s2303_s13  }
 0x461   : > { %p17_p4 = scmp.ge.s32.totalorder %s20_s13, 6  }
 0x463   :  { %19 = sbr.rel (!%p17_p4) target bundleno = 1 (0x1), region = 96 }

</bundles_post_ra>
